<compile_context>
chip_gen: v6e
topology: v6e:2x2x1
jax: 0.10.0
libtpu: 0.0.40
codegen_flags: <defaults>
</compile_context>

<pallas_src>
import collections
import functools

import jax
import jax.numpy as jnp
from jax.experimental import pallas as pl
from jax.experimental.pallas import tpu as pltpu


_LANE = 128
_CHUNK = 32                      # rows of C per VPU FMA step inside a tile
_AUX_ROWS = 8                    # aux slab rows (sublane aligned)
_ROW_SX1, _ROW_SX2, _ROW_FINT, _ROW_WINT = 0, 1, 2, 3


def _round_up(x, m):
    return ((x + m - 1) // m) * m


_CovPrep = collections.namedtuple(
    "_CovPrep", ["cov_padded", "n", "width", "tb", "rows", "cols"])


def prepare_covariance(cov_matrix, cov_dtype=jnp.float32):
    """One-time (per fit) covariance preparation.

    Symmetrise, zero-pad to a tile-friendly width, cast to the streaming dtype and
    build the packed upper-triangle tile index list.  Hoisted out of the per-call
    path so each loss evaluation streams C once (no per-call pad/cast HBM traffic).
    """
    cov = jnp.asarray(cov_matrix, jnp.float32)
    n = int(cov.shape[0])
    width = max(_round_up(n, 256), 256)
    tb = 512 if width % 512 == 0 else 256
    nb = width // tb
    rows, cols = [], []
    for i in range(nb):
        for j in range(i, nb):            # packed upper triangle, row-major
            rows.append(i)
            cols.append(j)
    rows = jnp.asarray(rows, dtype=jnp.int32)
    cols = jnp.asarray(cols, dtype=jnp.int32)
    # d^T C d == d^T ((C + C^T)/2) d for any C; a symmetric C is what makes the
    # 2x off-diagonal upper-triangle weighting exact.
    sym = 0.5 * (cov + cov.T)
    cov_padded = jnp.zeros((width, width), jnp.float32).at[:n, :n].set(sym)
    cov_padded = cov_padded.astype(cov_dtype)
    return _CovPrep(cov_padded, n, width, tb, rows, cols)


def _vmem_limit_bytes(tb, itemsize, aux_width):
    need = (2 * tb * tb * itemsize          # double-buffered C tiles
            + 2 * tb * 512                  # d-column tiles (lane-padded layout)
            + 2 * 8 * tb * 4                # d-row tiles (sublane-padded layout)
            + 2 * _AUX_ROWS * aux_width * 4  # aux slab
            + _CHUNK * tb * 4               # accumulator scratch
            + (4 << 20))                    # headroom (output, sems, internals)
    try:
        vmem_cap = int(pltpu.get_tpu_info().vmem_capacity_bytes)
    except Exception:
        vmem_cap = 64 * 1024 * 1024
    # Generation-aware scoped-VMEM cap: stay well inside v7x's 64 MiB per-TC VMEM,
    # allow more headroom on 128 MiB parts (v5e/v6e).
    cap = 48 * 1024 * 1024 if vmem_cap <= 64 * 1024 * 1024 else 96 * 1024 * 1024
    return int(min(cap, max(16 * 1024 * 1024, need)))


# ---------------------------------------------------------------------------
# Kernel
# ---------------------------------------------------------------------------
def _chi2_kernel(rows_ref, cols_ref, *refs, extended, use_sx2, chunk):
    if extended:
        lag_ref, dcol_ref, drow_ref, cov_ref, slab_ref, out_ref, acc_ref = refs
    else:
        dcol_ref, drow_ref, cov_ref, out_ref, acc_ref = refs
        lag_ref = slab_ref = None

    t = pl.program_id(0)
    n_tiles = pl.num_programs(0)
    tb = cov_ref.shape[0]

    # NOTE: acc_ref / out_ref are resident across the sequential ('arbitrary')
    # tile axis.  Do NOT mark this axis 'parallel' without per-core accumulators.
    @pl.when(t == 0)
    def _init():
        acc_ref[...] = jnp.zeros_like(acc_ref)
        out_ref[...] = jnp.zeros_like(out_ref)

    # Strictly-upper tiles count twice (C is symmetric after the one-time prep);
    # diagonal block tiles count once.
    w = jnp.where(rows_ref[t] == cols_ref[t], 1.0, 2.0).astype(jnp.float32)
    dw = drow_ref[...] * w                                        # (1, tb)

    # VPU FMA contraction: fold d_row (incl. weight) and d_col per 32-row chunk so
    # the (chunk, tb) accumulator is position-agnostic; the single expensive
    # cross-lane reduce is deferred to the final tile.
    part = None
    for c in range(tb // chunk):
        blk = cov_ref[pl.ds(c * chunk, chunk), :].astype(jnp.float32)   # (chunk, tb)
        dcol = dcol_ref[pl.ds(c * chunk, chunk), :]                      # (chunk, 1)
        term = (blk * dcol) * dw
        part = term if part is None else part + term
    acc_ref[...] = acc_ref[...] + part

    @pl.when(t == n_tiles - 1)
    def _finalize():
        total = jnp.sum(acc_ref[...])
        if extended:
            if use_sx2:
                sx = slab_ref[_ROW_SX1:_ROW_SX2 + 1, :]                  # (2, aux)
            else:
                sx = slab_ref[_ROW_SX1:_ROW_SX1 + 1, :]                  # (1, aux)
            pos_pen = jnp.sum(jnp.maximum(-sx, 0.0))
            integral = jnp.sum(slab_ref[_ROW_FINT:_ROW_FINT + 1, :]
                               * slab_ref[_ROW_WINT:_ROW_WINT + 1, :])
            total = total + lag_ref[0] * pos_pen + lag_ref[1] * (integral - 1.0) ** 2
        out_ref[...] = out_ref[...] + total


# ---------------------------------------------------------------------------
# pallas_call wrapper
# ---------------------------------------------------------------------------
def _chi2_pallas(prep, d_col, d_row, slab, lag, *, extended, use_sx2):
    tb = prep.tb
    n_tiles = int(prep.rows.shape[0])
    itemsize = jnp.dtype(prep.cov_padded.dtype).itemsize
    aux_width = int(slab.shape[1]) if extended else _LANE

    kernel = functools.partial(_chi2_kernel, extended=extended,
                               use_sx2=use_sx2, chunk=_CHUNK)

    in_specs = []
    args = [prep.rows, prep.cols]
    if extended:
        # Runtime SMEM scalars -> no Mosaic recompile when the Lagrange
        # multipliers change during the fit.
        in_specs.append(pl.BlockSpec(memory_space=pltpu.MemorySpace.SMEM))
        args.append(lag)
    in_specs += [
        pl.BlockSpec((tb, 1), lambda t, rows, cols: (rows[t], 0)),          # d col
        pl.BlockSpec((1, tb), lambda t, rows, cols: (0, cols[t])),          # d row
        pl.BlockSpec((tb, tb), lambda t, rows, cols: (rows[t], cols[t])),   # C tile
    ]
    args += [d_col, d_row, prep.cov_padded]
    if extended:
        in_specs.append(pl.BlockSpec((_AUX_ROWS, aux_width),
                                     lambda t, rows, cols: (0, 0)))         # aux slab
        args.append(slab)

    grid_spec = pltpu.PrefetchScalarGridSpec(
        num_scalar_prefetch=2,
        grid=(n_tiles,),
        in_specs=in_specs,
        out_specs=pl.BlockSpec((1, 1), lambda t, rows, cols: (0, 0)),
        scratch_shapes=[pltpu.VMEM((_CHUNK, tb), jnp.float32)],
    )

    out = pl.pallas_call(
        kernel,
        out_shape=jax.ShapeDtypeStruct((1, 1), jnp.float32),
        grid_spec=grid_spec,
        compiler_params=pltpu.CompilerParams(
            dimension_semantics=("arbitrary",),
            vmem_limit_bytes=_vmem_limit_bytes(tb, itemsize, aux_width)),
    )(*args)
    return out[0, 0]


def _build_aux_slab(small_x_point1, small_x_point2, model_x_int, x_int):
    """Pack the small penalty vectors into one lane-dense slab (a single DMA)."""
    sx1 = jnp.asarray(small_x_point1, jnp.float32).reshape(-1)
    lengths = [int(sx1.shape[0])]
    sx2 = None
    if small_x_point2 is not None:
        sx2 = jnp.asarray(small_x_point2, jnp.float32).reshape(-1)
        lengths.append(int(sx2.shape[0]))
    f_int = jnp.asarray(model_x_int, jnp.float32).reshape(-1)
    x = jnp.asarray(x_int, jnp.float32).reshape(-1)
    m = int(x.shape[0])
    lengths.append(m)

    # Trapezoid weights precomputed here, so the kernel does one multiply+reduce
    # instead of off-by-one lane slices (XLU relayouts).
    w_int = jnp.zeros((m,), jnp.float32)
    if m > 1:
        dx = x[1:] - x[:-1]
        w_int = w_int.at[:-1].add(0.5 * dx).at[1:].add(0.5 * dx)

    aux_width = _round_up(max(max(lengths), 1), _LANE)
    slab = jnp.zeros((_AUX_ROWS, aux_width), jnp.float32)
    slab = slab.at[_ROW_SX1, :sx1.shape[0]].set(sx1)
    if sx2 is not None:
        slab = slab.at[_ROW_SX2, :sx2.shape[0]].set(sx2)
    slab = slab.at[_ROW_FINT, :f_int.shape[0]].set(f_int)
    slab = slab.at[_ROW_WINT, :w_int.shape[0]].set(w_int)
    return slab


# ---------------------------------------------------------------------------
# Module wrapper
# ---------------------------------------------------------------------------
class CustomLoss:
    """JAX/Pallas port of the PyTorch CustomLoss module (forward pass).

    cov_dtype=jnp.bfloat16 halves the HBM bytes of the dominant C stream (keep an
    f32 instance for final high-precision evaluations).  The padded/symmetrised
    covariance is cached per instance, so repeated calls with the same cov array
    pay the prep cost only once.
    """

    def __init__(self, extended_loss: bool, num_output_layers: int,
                 cov_dtype=jnp.float32, fast_path_max_width: int = 256):
        self.extended_loss = extended_loss
        self.num_output_layers = num_output_layers
        self.cov_dtype = cov_dtype
        self.fast_path_max_width = fast_path_max_width
        self._cov_src = None
        self._cov_prep = None

    def prepare_covariance(self, cov_matrix):
        self._cov_src = cov_matrix
        self._cov_prep = prepare_covariance(cov_matrix, self.cov_dtype)
        return self._cov_prep

    def _prepared(self, cov_matrix):
        if self._cov_prep is None or cov_matrix is not self._cov_src:
            self.prepare_covariance(cov_matrix)
        return self._cov_prep

    def __call__(self, pred, data, cov_matrix, small_x_point1, small_x_point2,
                 model_x_int, x_int, lag_mult_pos, lag_mult_int):
        # TODO(synk): the original signature receives `model` (an nn.Module) and
        # evaluates model(x_int) inside the loss; arbitrary module evaluation has
        # no Pallas equivalent, so callers pass the precomputed outputs
        # `model_x_int` instead.
        extended = self.extended_loss
        use_sx2 = extended and self.num_output_layers == 2

        pred = jnp.asarray(pred, jnp.float32).reshape(-1)
        data = jnp.asarray(data, jnp.float32).reshape(-1)
        n = int(pred.shape[0])

        # Small-problem fast path: pallas_call + per-step overhead dwarfs a
        # sub-MiB contraction, so plain XLA wins there.
        if max(_round_up(n, 256), 256) <= self.fast_path_max_width:
            return _reference_loss(pred, data, cov_matrix, small_x_point1,
                                   small_x_point2, model_x_int, x_int,
                                   lag_mult_pos, lag_mult_int,
                                   extended, self.num_output_layers)

        prep = self._prepared(cov_matrix)
        assert prep.n == n == int(data.shape[0])

        d = jnp.zeros((prep.width,), jnp.float32).at[:n].set(pred - data)
        d_col = d.reshape(prep.width, 1)
        d_row = d.reshape(1, prep.width)

        slab = lag = None
        if extended:
            slab = _build_aux_slab(small_x_point1,
                                   small_x_point2 if use_sx2 else None,
                                   model_x_int, x_int)
            lag = jnp.stack([jnp.asarray(lag_mult_pos, jnp.float32),
                             jnp.asarray(lag_mult_int, jnp.float32)])

        return _chi2_pallas(prep, d_col, d_row, slab, lag,
                            extended=extended, use_sx2=use_sx2)


# ---------------------------------------------------------------------------
# Pure-JAX reference (for correctness checks and the small-problem fast path)
# ---------------------------------------------------------------------------
def _reference_loss(pred, data, cov, sx1, sx2, f_int, x_int, lp, li,
                    extended, num_output_layers):
    pred = jnp.asarray(pred, jnp.float32).reshape(-1)
    data = jnp.asarray(data, jnp.float32).reshape(-1)
    d = pred - data
    chi2 = d @ jnp.asarray(cov, jnp.float32) @ d
    if not extended:
        return chi2
    sx1 = jnp.asarray(sx1, jnp.float32).reshape(-1)
    pos = jnp.sum(jnp.maximum(-sx1, 0.0))
    if num_output_layers == 2:
        sx2 = jnp.asarray(sx2, jnp.float32).reshape(-1)
        pos = pos + jnp.sum(jnp.maximum(-sx2, 0.0))
    x = jnp.asarray(x_int, jnp.float32).reshape(-1)
    f = jnp.asarray(f_int, jnp.float32).reshape(-1)
    integral = jnp.sum(0.5 * (f[1:] + f[:-1]) * (x[1:] - x[:-1]))
    return chi2 + lp * pos + li * (integral - 1.0) ** 2


# ---------------------------------------------------------------------------
# Demo / smoke test
# ---------------------------------------------------------------------------
if __name__ == "__main__":
    key = jax.random.PRNGKey(0)
    k_pred, k_data, k_cov, k_sx1, k_sx2, k_fint = jax.random.split(key, 6)

    # width pads to 768 -> TB=256, 3x3 block triangle (6 tiles, incl. off-diagonal)
    N, P, M = 600, 8, 32

    pred = jax.random.normal(k_pred, (N,), dtype=jnp.float32)
    data = jax.random.normal(k_data, (N,), dtype=jnp.float32)

    a = jax.random.normal(k_cov, (N, N), dtype=jnp.float32)
    cov_matrix = a @ a.T / N + jnp.eye(N, dtype=jnp.float32)   # symmetric PD

    small_x_point1 = jax.random.normal(k_sx1, (P,), dtype=jnp.float32)
    small_x_point2 = jax.random.normal(k_sx2, (P,), dtype=jnp.float32)
    x_int = jnp.linspace(1e-3, 1.0, M, dtype=jnp.float32)
    model_x_int = jnp.abs(jax.random.normal(k_fint, (M,), dtype=jnp.float32))

    lag_mult_pos, lag_mult_int = 10.0, 5.0

    # raw chi-squared mode (f32 C stream)
    raw_fn = CustomLoss(extended_loss=False, num_output_layers=1)
    raw_val = raw_fn(pred, data, cov_matrix, small_x_point1, small_x_point2,
                     model_x_int, x_int, lag_mult_pos, lag_mult_int)

    # extended mode, combined nu + nubar
    ext1_fn = CustomLoss(extended_loss=True, num_output_layers=1)
    ext1_val = ext1_fn(pred, data, cov_matrix, small_x_point1, None,
                       model_x_int, x_int, lag_mult_pos, lag_mult_int)

    # extended mode, separate nu / nubar outputs
    ext2_fn = CustomLoss(extended_loss=True, num_output_layers=2)
    ext2_val = ext2_fn(pred, data, cov_matrix, small_x_point1, small_x_point2,
                       model_x_int, x_int, lag_mult_pos, lag_mult_int)

    # bf16-streamed C (recommended for the bulk of the fit; halves HBM bytes)
    raw_bf16_fn = CustomLoss(extended_loss=False, num_output_layers=1,
                             cov_dtype=jnp.bfloat16)
    raw_bf16_val = raw_bf16_fn(pred, data, cov_matrix, small_x_point1,
                               small_x_point2, model_x_int, x_int,
                               lag_mult_pos, lag_mult_int)

    # tiny problem exercises the plain-XLA fast path
    Ns = 48
    pred_s, data_s, cov_s = pred[:Ns], data[:Ns], cov_matrix[:Ns, :Ns]
    small_fn = CustomLoss(extended_loss=False, num_output_layers=1)
    small_val = small_fn(pred_s, data_s, cov_s, small_x_point1, small_x_point2,
                         model_x_int, x_int, lag_mult_pos, lag_mult_int)

    jax.block_until_ready((raw_val, ext1_val, ext2_val, raw_bf16_val, small_val))

    raw_ref = _reference_loss(pred, data, cov_matrix, small_x_point1,
                              small_x_point2, model_x_int, x_int,
                              lag_mult_pos, lag_mult_int, False, 1)
    ext1_ref = _reference_loss(pred, data, cov_matrix, small_x_point1,
                               small_x_point2, model_x_int, x_int,
                               lag_mult_pos, lag_mult_int, True, 1)
    ext2_ref = _reference_loss(pred, data, cov_matrix, small_x_point1,
                               small_x_point2, model_x_int, x_int,
                               lag_mult_pos, lag_mult_int, True, 2)
    small_ref = _reference_loss(pred_s, data_s, cov_s, small_x_point1,
                                small_x_point2, model_x_int, x_int,
                                lag_mult_pos, lag_mult_int, False, 1)

    checks = [
        (raw_val, raw_ref, 5e-3),
        (ext1_val, ext1_ref, 5e-3),
        (ext2_val, ext2_ref, 5e-3),
        (raw_bf16_val, raw_ref, 3e-2),
        (small_val, small_ref, 5e-3),
    ]
    for got, want, rtol in checks:
        got = jnp.asarray(got)
        assert got.shape == (), got.shape
        assert bool(jnp.isfinite(got))
        assert bool(jnp.allclose(got, want, rtol=rtol, atol=1e-2)), (got, want)

    print("KERNEL_OK")
</pallas_src>

<mosaic_0001>
module attributes {stable_mosaic.version = 11 : i64} {
  func.func @_chi2_kernel(%arg0: i32, %arg1: memref<6xi32, #tpu.memory_space<smem>>, %arg2: memref<6xi32, #tpu.memory_space<smem>>, %arg3: memref<256x1xf32, #tpu.memory_space<vmem>>, %arg4: memref<1x256xf32, #tpu.memory_space<vmem>>, %arg5: memref<256x256xf32, #tpu.memory_space<vmem>>, %arg6: memref<1x1xf32, #tpu.memory_space<vmem>>, %arg7: memref<32x256xf32, #tpu.memory_space<vmem>>) attributes {dimension_semantics = [#tpu.dimension_semantics<arbitrary>], iteration_bounds = array<i64: 6>, scalar_prefetch = 2 : i64, scratch_operands = 1 : i64, tpu.core_type = #tpu.core_type<tc>, window_params = [{transform_indices = @transform_0, window_bounds = array<i64: 256, 1>}, {transform_indices = @transform_1, window_bounds = array<i64: 1, 256>}, {transform_indices = @transform_2, window_bounds = array<i64: 256, 256>}, {pipeline_mode = #tpu.pipeline_mode<synchronous>, transform_indices = @transform_3, window_bounds = array<i64: 1, 1>}]} {
    %c0_i32 = arith.constant 0 : i32
    %0 = arith.cmpi eq, %arg0, %c0_i32 : i32
    %1 = arith.extui %0 : i1 to i32
    %c0_i32_0 = arith.constant 0 : i32
    %2 = arith.cmpi ne, %1, %c0_i32_0 : i32
    scf.if %2 {
      %cst_33 = arith.constant 0.000000e+00 : f32
      %73 = vector.broadcast %cst_33 : f32 to vector<32x256xf32>
      %c0_34 = arith.constant 0 : index
      %c0_35 = arith.constant 0 : index
      %74 = vector.load %arg7[%c0_34, %c0_35] : memref<32x256xf32, #tpu.memory_space<vmem>>, vector<32x256xf32>
      tpu.vector_store %arg7[%c0_34, %c0_35], %73 {strides = array<i32>} : memref<32x256xf32, #tpu.memory_space<vmem>>, vector<32x256xf32>,
      %cst_36 = arith.constant 0.000000e+00 : f32
      %75 = vector.broadcast %cst_36 : f32 to vector<1x1xf32>
      %c0_37 = arith.constant 0 : index
      %c0_38 = arith.constant 0 : index
      %76 = vector.load %arg6[%c0_37, %c0_38] : memref<1x1xf32, #tpu.memory_space<vmem>>, vector<1x1xf32>
      tpu.vector_store %arg6[%c0_37, %c0_38], %75 {strides = array<i32>} : memref<1x1xf32, #tpu.memory_space<vmem>>, vector<1x1xf32>,
    } else {
    }
    %3 = arith.index_cast %arg0 : i32 to index
    %4 = memref.load %arg1[%3] : memref<6xi32, #tpu.memory_space<smem>>
    %5 = arith.index_cast %arg0 : i32 to index
    %6 = memref.load %arg2[%5] : memref<6xi32, #tpu.memory_space<smem>>
    %7 = arith.cmpi eq, %4, %6 : i32
    %cst = arith.constant 1.000000e+00 : f32
    %cst_1 = arith.constant 2.000000e+00 : f32
    %8 = arith.select %7, %cst, %cst_1 : f32
    %c0 = arith.constant 0 : index
    %c0_2 = arith.constant 0 : index
    %9 = vector.load %arg4[%c0, %c0_2] : memref<1x256xf32, #tpu.memory_space<vmem>>, vector<1x256xf32>
    %10 = vector.broadcast %8 : f32 to vector<1x256xf32>
    %11 = arith.mulf %9, %10 : vector<1x256xf32>
    %c0_3 = arith.constant 0 : index
    %c0_4 = arith.constant 0 : index
    %12 = vector.load %arg5[%c0_3, %c0_4] : memref<256x256xf32, #tpu.memory_space<vmem>>, vector<32x256xf32>
    %c0_5 = arith.constant 0 : index
    %c0_6 = arith.constant 0 : index
    %13 = vector.load %arg3[%c0_5, %c0_6] : memref<256x1xf32, #tpu.memory_space<vmem>>, vector<32x1xf32>
    %14 = vector.broadcast %13 : vector<32x1xf32> to vector<32x256xf32>
    %15 = arith.mulf %12, %14 : vector<32x256xf32>
    %16 = vector.broadcast %11 : vector<1x256xf32> to vector<32x256xf32>
    %17 = arith.mulf %15, %16 : vector<32x256xf32>
    %c32 = arith.constant 32 : index
    %c0_7 = arith.constant 0 : index
    %18 = vector.load %arg5[%c32, %c0_7] : memref<256x256xf32, #tpu.memory_space<vmem>>, vector<32x256xf32>
    %c32_8 = arith.constant 32 : index
    %c0_9 = arith.constant 0 : index
    %19 = vector.load %arg3[%c32_8, %c0_9] : memref<256x1xf32, #tpu.memory_space<vmem>>, vector<32x1xf32>
    %20 = vector.broadcast %19 : vector<32x1xf32> to vector<32x256xf32>
    %21 = arith.mulf %18, %20 : vector<32x256xf32>
    %22 = vector.broadcast %11 : vector<1x256xf32> to vector<32x256xf32>
    %23 = arith.mulf %21, %22 : vector<32x256xf32>
    %24 = arith.addf %17, %23 : vector<32x256xf32>
    %c64 = arith.constant 64 : index
    %c0_10 = arith.constant 0 : index
    %25 = vector.load %arg5[%c64, %c0_10] : memref<256x256xf32, #tpu.memory_space<vmem>>, vector<32x256xf32>
    %c64_11 = arith.constant 64 : index
    %c0_12 = arith.constant 0 : index
    %26 = vector.load %arg3[%c64_11, %c0_12] : memref<256x1xf32, #tpu.memory_space<vmem>>, vector<32x1xf32>
    %27 = vector.broadcast %26 : vector<32x1xf32> to vector<32x256xf32>
    %28 = arith.mulf %25, %27 : vector<32x256xf32>
    %29 = vector.broadcast %11 : vector<1x256xf32> to vector<32x256xf32>
    %30 = arith.mulf %28, %29 : vector<32x256xf32>
    %31 = arith.addf %24, %30 : vector<32x256xf32>
    %c96 = arith.constant 96 : index
    %c0_13 = arith.constant 0 : index
    %32 = vector.load %arg5[%c96, %c0_13] : memref<256x256xf32, #tpu.memory_space<vmem>>, vector<32x256xf32>
    %c96_14 = arith.constant 96 : index
    %c0_15 = arith.constant 0 : index
    %33 = vector.load %arg3[%c96_14, %c0_15] : memref<256x1xf32, #tpu.memory_space<vmem>>, vector<32x1xf32>
    %34 = vector.broadcast %33 : vector<32x1xf32> to vector<32x256xf32>
    %35 = arith.mulf %32, %34 : vector<32x256xf32>
    %36 = vector.broadcast %11 : vector<1x256xf32> to vector<32x256xf32>
    %37 = arith.mulf %35, %36 : vector<32x256xf32>
    %38 = arith.addf %31, %37 : vector<32x256xf32>
    %c128 = arith.constant 128 : index
    %c0_16 = arith.constant 0 : index
    %39 = vector.load %arg5[%c128, %c0_16] : memref<256x256xf32, #tpu.memory_space<vmem>>, vector<32x256xf32>
    %c128_17 = arith.constant 128 : index
    %c0_18 = arith.constant 0 : index
    %40 = vector.load %arg3[%c128_17, %c0_18] : memref<256x1xf32, #tpu.memory_space<vmem>>, vector<32x1xf32>
    %41 = vector.broadcast %40 : vector<32x1xf32> to vector<32x256xf32>
    %42 = arith.mulf %39, %41 : vector<32x256xf32>
    %43 = vector.broadcast %11 : vector<1x256xf32> to vector<32x256xf32>
    %44 = arith.mulf %42, %43 : vector<32x256xf32>
    %45 = arith.addf %38, %44 : vector<32x256xf32>
    %c160 = arith.constant 160 : index
    %c0_19 = arith.constant 0 : index
    %46 = vector.load %arg5[%c160, %c0_19] : memref<256x256xf32, #tpu.memory_space<vmem>>, vector<32x256xf32>
    %c160_20 = arith.constant 160 : index
    %c0_21 = arith.constant 0 : index
    %47 = vector.load %arg3[%c160_20, %c0_21] : memref<256x1xf32, #tpu.memory_space<vmem>>, vector<32x1xf32>
    %48 = vector.broadcast %47 : vector<32x1xf32> to vector<32x256xf32>
    %49 = arith.mulf %46, %48 : vector<32x256xf32>
    %50 = vector.broadcast %11 : vector<1x256xf32> to vector<32x256xf32>
    %51 = arith.mulf %49, %50 : vector<32x256xf32>
    %52 = arith.addf %45, %51 : vector<32x256xf32>
    %c192 = arith.constant 192 : index
    %c0_22 = arith.constant 0 : index
    %53 = vector.load %arg5[%c192, %c0_22] : memref<256x256xf32, #tpu.memory_space<vmem>>, vector<32x256xf32>
    %c192_23 = arith.constant 192 : index
    %c0_24 = arith.constant 0 : index
    %54 = vector.load %arg3[%c192_23, %c0_24] : memref<256x1xf32, #tpu.memory_space<vmem>>, vector<32x1xf32>
    %55 = vector.broadcast %54 : vector<32x1xf32> to vector<32x256xf32>
    %56 = arith.mulf %53, %55 : vector<32x256xf32>
    %57 = vector.broadcast %11 : vector<1x256xf32> to vector<32x256xf32>
    %58 = arith.mulf %56, %57 : vector<32x256xf32>
    %59 = arith.addf %52, %58 : vector<32x256xf32>
    %c224 = arith.constant 224 : index
    %c0_25 = arith.constant 0 : index
    %60 = vector.load %arg5[%c224, %c0_25] : memref<256x256xf32, #tpu.memory_space<vmem>>, vector<32x256xf32>
    %c224_26 = arith.constant 224 : index
    %c0_27 = arith.constant 0 : index
    %61 = vector.load %arg3[%c224_26, %c0_27] : memref<256x1xf32, #tpu.memory_space<vmem>>, vector<32x1xf32>
    %62 = vector.broadcast %61 : vector<32x1xf32> to vector<32x256xf32>
    %63 = arith.mulf %60, %62 : vector<32x256xf32>
    %64 = vector.broadcast %11 : vector<1x256xf32> to vector<32x256xf32>
    %65 = arith.mulf %63, %64 : vector<32x256xf32>
    %66 = arith.addf %59, %65 : vector<32x256xf32>
    %c0_28 = arith.constant 0 : index
    %c0_29 = arith.constant 0 : index
    %67 = vector.load %arg7[%c0_28, %c0_29] : memref<32x256xf32, #tpu.memory_space<vmem>>, vector<32x256xf32>
    %68 = arith.addf %67, %66 : vector<32x256xf32>
    %c0_30 = arith.constant 0 : index
    %c0_31 = arith.constant 0 : index
    %69 = vector.load %arg7[%c0_30, %c0_31] : memref<32x256xf32, #tpu.memory_space<vmem>>, vector<32x256xf32>
    tpu.vector_store %arg7[%c0_30, %c0_31], %68 {strides = array<i32>} : memref<32x256xf32, #tpu.memory_space<vmem>>, vector<32x256xf32>,
    %c5_i32 = arith.constant 5 : i32
    %70 = arith.cmpi eq, %arg0, %c5_i32 : i32
    %71 = arith.extui %70 : i1 to i32
    %c0_i32_32 = arith.constant 0 : i32
    %72 = arith.cmpi ne, %71, %c0_i32_32 : i32
    scf.if %72 {
      %c0_33 = arith.constant 0 : index
      %c0_34 = arith.constant 0 : index
      %73 = vector.load %arg7[%c0_33, %c0_34] : memref<32x256xf32, #tpu.memory_space<vmem>>, vector<32x256xf32>
      %74 = vector.shape_cast %73 : vector<32x256xf32> to vector<1x32x256xf32>
      %cst_35 = arith.constant dense<0.000000e+00> : vector<1xf32>
      %75 = vector.multi_reduction <add>, %74, %cst_35 [1, 2] : vector<1x32x256xf32> to vector<1xf32>
      %76 = vector.shape_cast %75 : vector<1xf32> to vector<1x1x1xf32>
      %77 = vector.extract %76[0, 0, 0] : f32 from vector<1x1x1xf32>
      %c0_36 = arith.constant 0 : index
      %c0_37 = arith.constant 0 : index
      %78 = vector.load %arg6[%c0_36, %c0_37] : memref<1x1xf32, #tpu.memory_space<vmem>>, vector<1x1xf32>
      %79 = vector.broadcast %77 : f32 to vector<1x1xf32>
      %80 = arith.addf %78, %79 : vector<1x1xf32>
      %c0_38 = arith.constant 0 : index
      %c0_39 = arith.constant 0 : index
      %81 = vector.load %arg6[%c0_38, %c0_39] : memref<1x1xf32, #tpu.memory_space<vmem>>, vector<1x1xf32>
      tpu.vector_store %arg6[%c0_38, %c0_39], %80 {strides = array<i32>} : memref<1x1xf32, #tpu.memory_space<vmem>>, vector<1x1xf32>,
    } else {
    }
    return
  }
  func.func @transform_0(%arg0: i32, %arg1: memref<6xi32, #tpu.memory_space<smem>>, %arg2: memref<6xi32, #tpu.memory_space<smem>>) -> (i32, i32) {
    %0 = arith.index_cast %arg0 : i32 to index
    %1 = memref.load %arg1[%0] : memref<6xi32, #tpu.memory_space<smem>>
    %c0_i32 = arith.constant 0 : i32
    %c0_i32_0 = arith.constant 0 : i32
    return %1, %c0_i32 : i32, i32
  }
  func.func @transform_1(%arg0: i32, %arg1: memref<6xi32, #tpu.memory_space<smem>>, %arg2: memref<6xi32, #tpu.memory_space<smem>>) -> (i32, i32) {
    %0 = arith.index_cast %arg0 : i32 to index
    %1 = memref.load %arg2[%0] : memref<6xi32, #tpu.memory_space<smem>>
    %c0_i32 = arith.constant 0 : i32
    %c0_i32_0 = arith.constant 0 : i32
    return %c0_i32, %1 : i32, i32
  }
  func.func @transform_2(%arg0: i32, %arg1: memref<6xi32, #tpu.memory_space<smem>>, %arg2: memref<6xi32, #tpu.memory_space<smem>>) -> (i32, i32) {
    %0 = arith.index_cast %arg0 : i32 to index
    %1 = memref.load %arg1[%0] : memref<6xi32, #tpu.memory_space<smem>>
    %2 = arith.index_cast %arg0 : i32 to index
    %3 = memref.load %arg2[%2] : memref<6xi32, #tpu.memory_space<smem>>
    %c0_i32 = arith.constant 0 : i32
    return %1, %3 : i32, i32
  }
  func.func @transform_3(%arg0: i32, %arg1: memref<6xi32, #tpu.memory_space<smem>>, %arg2: memref<6xi32, #tpu.memory_space<smem>>) -> (i32, i32) {
    %c0_i32 = arith.constant 0 : i32
    %c0_i32_0 = arith.constant 0 : i32
    %c0_i32_1 = arith.constant 0 : i32
    return %c0_i32, %c0_i32_0 : i32, i32
  }
}

</mosaic_0001>

<bundles_post_ra>
// kernel: tpu_custom_call.1
= control target key start
LH: loop header
LB: loop body
LE: loop exit
PB: predicated region body
PF: predicated region fallthrough
CT: control target
= control target key end

     0   :  { %s1184_s18 = smov [#allocation4]   ;;  %s1185_s21 = smov [#allocation5]   ;;  %s1648_s0 = inlined_call_operand.hbm [shape: s32[6], index: 0, kind: input, shape index: {}]   ;;  %s1649_s2 = inlined_call_operand.vmem [shape: f32[768,1], index: 2, kind: input, shape index: {}]   ;;  %s1650_s3 = inlined_call_operand.hbm [shape: f32[1,768], index: 3, kind: input, shape index: {}]   ;;  %s1651_s4 = inlined_call_operand.hbm [shape: f32[768,768], index: 4, kind: input, shape index: {}]   ;;  %s1652_s5 = inlined_call_operand.hbm [shape: f32[1,1], index: 5, kind: output, shape index: {}]   ;;  %s1653_s1 = inlined_call_operand.hbm [shape: s32[6], index: 1, kind: input, shape index: {}]  }
   0x1   :  { %11 = dma.hbm_to_smem %s1648_s0, 16, %s1184_s18, [#allocation3] }
   0x2   :  { %13 = dma.hbm_to_smem %s1653_s1, 16, %s1185_s21, [#allocation3] }
   0x3   :  { %1142 = dma.done.wait [#allocation3], 32 }
   0x4   :  { %1143 = vsyncadd [#allocation3], 4294967264 }
   0x5   :  { %15 = sfence }
   0x6   :  { %16 = vsyncpa [#allocation7], 0 }
   0x7   :  { %18 = vsyncpa [#allocation7 + $0x1], 0 }
   0x8   :  { %19 = vsyncpa [#allocation10], 0 }
   0x9   :  { %21 = vsyncpa [#allocation10 + $0x1], 0 }
   0xa   :  { %22 = vsyncpa [#allocation8], 0  ;;  %s1230_s24 = smov 0   ;;  %s1232_s25 = smov 0  }
   0xb   :  { %s1234_s26 = smov 0   ;;  %s1236_s0 = smov 0  }
   0xc   :  { %s1238_s27 = smov 0   ;;  %s1240_s28 = smov 0  }
   0xd   :  { %s1242_s1 = smov 0  }
   0xe LB: > { %1660 = sst [smem:[#allocation22_spill]] %s1178_s28  ;;  %s1262_s29 = sadd.s32 1, %s1182_s1   ;;  %s1182_s1 = sphi %s1242_s1, %s1686_s1   ;;  %s1178_s28 = sphi %s1240_s28, %s1680_s28   ;;  %s1174_s27 = sphi %s1238_s27, %s1685_s27   ;;  %s1170_s0 = sphi %s1236_s0, %s1684_s0   ;;  %s1166_s26 = sphi %s1234_s26, %s1683_s26   ;;  %s1162_s25 = sphi %s1232_s25, %s1682_s25   ;;  %s1158_s24 = sphi %s1230_s24, %s1681_s24  }
   0xf   : > { %s1265_s30 = sadd.s32 4294967295, %s1182_s1   ;;  %s60_s6 = sld [smem:[#allocation5 + %s1182_s1]] }
  0x10   : > { %s61_s7 = sld [smem:[#allocation5 + %s1262_s29]]  ;;  %p72_p0 = scmp.ne.s32.totalorder %s1178_s28, %s1174_s27 }
  0x11   : > { %p78_p1 = scmp.ne.s32.totalorder %s1174_s27, %s1170_s0  ;;  %p79_p2 = scmp.eq.s32.totalorder %s1265_s30, 0 }
  0x12   : > { %s88_s8 = sld [smem:[#allocation4 + %s1182_s1]]  ;;  %p73_p3 = scmp.eq.s32.totalorder %s1182_s1, 0 }
  0x13   : > { %s89_s9 = sld [smem:[#allocation5 + %s1182_s1]]  ;;  %p1278_p4 = por %p79_p2, %p78_p1 }
  0x14   : > { %s90_s11 = sld [smem:[#allocation4 + %s1262_s29]]  ;;  %s65_s12 = sadd.s32 1, %s1178_s28 }
  0x15   : > { %s1661_s10 = scalar_select %p1278_p4, 1, 0 }
  0x16   : > { %s91_s13 = sld [smem:[#allocation5 + %s1262_s29]]  ;;  %s62_s14 = ssub.s32 %s60_s6, %s61_s7 }
  0x17   : > { %p1287_p5 = por %p73_p3, %p72_p0  ;;  %p63_p6 = scmp.eq.s32.totalorder %s62_s14, 0 }
  0x18   : > { %p110_p7 = scmp.ne.s32.totalorder %s1162_s25, %s1158_s24  ;;  %s97_s16 = sadd.s32 1, %s1166_s26 }
  0x19   : > { %s1294_s17 = scalar_select %p63_p6, %s1178_s28, %s65_s12  }
  0x1a   : > { %s92_s18 = ssub.s32 %s88_s8, %s90_s11  ;;  %p1298_p8 = por %p110_p7, %p79_p2 }
  0x1b   : > { %1663 = sst [smem:[#allocation23_spill]] %s1294_s17  ;;  %p1655_p9 = scmp.lt.s32.totalorder %s1182_s1, 6 }
  0x1c   : > { %s1664_s19 = scalar_select %p1298_p8, 1, 0 }
  0x1d   : > { %s93_s20 = ssub.s32 %s89_s9, %s91_s13  ;;  %s166_s22 = sand.u32 1, %s1178_s28  }
  0x1e   : > { %s94_s21 = sor.u32 %s93_s20, %s92_s18  ;;  %p104_p11 = scmp.ne.s32.totalorder %s1166_s26, %s1162_s25 }
  0x1f   : > { %p95_p10 = scmp.eq.s32.totalorder %s94_s21, 0  ;;  %s899_s23 = sshll.u32 %s166_s22, 1 }
  0x20   : > { %p1310_p12 = pnand %p1655_p9, %p1287_p5  ;;  %s170_s8 = scalar_lea.vmem [#allocation6], %s899_s23 }
  0x21   : > { %s1315_s0 = scalar_select %p95_p10, %s1166_s26, %s97_s16  }
  0x22   : > { %s922_s6 = scalar_select %p1287_p5, [#allocation5], [#allocation12] }
  0x23   : > { %s923_s7 = scalar_select %p1287_p5, %s1182_s1, 0 }
  0x24   : > { %s1688_s6 = smov (!%p1655_p9, %s922_s6), [#allocation15]  ;;  %s179_s9 = sshll.u32 %s170_s8, 4  ;;  %s1334_s9 = int_to_ptr.vmem [resolvable:$true] %s179_s9 }
  0x25   : > { %s1690_s7 = smov (!%p1655_p9, %s923_s7), 0  ;;  %p907_p13 = scmp.ge.s32.totalorder %s1182_s1, 1 }
  0x26   : > { %p1329_p0 = por %p104_p11, %p73_p3  ;;  %s171_s12 = sld [smem:[%s1688_s6 + %s1690_s7]] }
  0x27   : > { %p210_p1 = scmp.lt.s32.totalorder %s1182_s1, 7  ;;  %s186_s14 = sand.u32 1, %s1166_s26  }
  0x28   : > { %s1666_s11 = scalar_select %p1329_p0, 1, 0 }
  0x29   : > { %p1336_p2 = pnand %p907_p13, %p210_p1  ;;  %s1351_s8 = sshll.u32 %s186_s14, 9 }
  0x2a   : > { %s167_s6 = scalar_lea.sflag [#allocation7], %s166_s22  ;;  %p1036_p5 = pneg %p1310_p12 }
  0x2b   : > { %s1667_s13 = scalar_select %p1336_p2, 1, 0 }
  0x2c   : > { %s918_s18 = sshll.u32 %s171_s12, 5  ;;  %s1039_s15 = scalar_lea.hbm %s1650_s3, 96 }
  0x2d   : > { %s177_s23 = scalar_lea.hbm %s1650_s3, %s918_s18 }
  0x2e   : > { %s1034_s7 = scalar_lea.hbm %s177_s23, 32  ;;  %p1040_p10 = scmp.lt.s32.totalorder %s177_s23, %s1650_s3 }
  0x2f   : > { %p1035_p3 = scmp.ne.s32.totalorder %s177_s23, %s1034_s7  ;;  %p1041_p11 = scmp.lt.s32.totalorder %s1039_s15, %s1034_s7 }
  0x31   : > { %p1037_p6 = pnand %p1036_p5, %p1035_p3  ;;  %p1042_p13 = por %p1041_p11, %p1040_p10 }
  0x33   : > { %p1038_p7 = pneg %p1037_p6 }
  0x35   : > { %p1043_p1 = pnand %p1042_p13, %p1038_p7 }
  0x37   : > { %1046 = shalt.err (!%p1043_p1)
}
  0x38   : > { %s1047_s22 = scalar_lea.vmem %s1334_s9, 32  ;;  %s1186_s18 = smov [#allocation6]  }
  0x39   : > { %p1048_p9 = scmp.ne.s32.totalorder %s1334_s9, %s1047_s22  ;;  %s1052_s20 = sshll.u32 %s1186_s18, 4  ;;  %s1053_s20 = int_to_ptr.vmem [resolvable:$false] %s1052_s20 }
  0x3a   : > { %s1054_s28 = scalar_lea.vmem %s1053_s20, 64  ;;  %p1055_p6 = scmp.lt.s32.totalorder %s1334_s9, %s1053_s20 }
  0x3b   : > { %p1050_p8 = pnand %p1048_p9, %p1036_p5  ;;  %p1056_p4 = scmp.lt.s32.totalorder %s1054_s28, %s1047_s22 }
  0x3d   : > { %p1051_p3 = pneg %p1050_p8  ;;  %p1057_p2 = por %p1056_p4, %p1055_p6 }
  0x3f   : > { %p1058_p0 = pnand %p1057_p2, %p1051_p3 }
  0x41   : > { %1061 = shalt.err (!%p1058_p0)
}
  0x42   : > { %941 = dma.hbm_to_vmem [thread:$0]  (!%p1310_p12), %s177_s23, 32, %s1334_s9, %s167_s6  }
  0x43   : > { %p1668_p8 = scmp.ne.s32.totalorder %s1666_s11, 0  ;;  %p1670_p9 = scmp.lt.s32.totalorder %s1182_s1, 6 }
  0x44   : > { %s190_s23 = scalar_lea.vmem [#allocation9], %s1351_s8 }
  0x45   : > { %s1669_s17 = scalar_select %p1668_p8, [#allocation4], [#allocation13] }
  0x46   : > { %s1671_s15 = scalar_select %p1668_p8, %s1182_s1, 0 }
  0x47   : > { %s1692_s17 = smov (!%p1670_p9, %s1669_s17), [#allocation16]  ;;  %p1672_p4 = pmov %p1670_p9 }
  0x48   : > { %s927_s24 = scalar_select %p1668_p8, [#allocation5], [#allocation14] }
  0x49   : > { %s1694_s15 = smov (!%p1672_p4, %s1671_s15), 0  ;;  %p1673_p0 = pmov %p1672_p4 }
  0x4a   : > { %s191_s16 = sld [smem:[%s1692_s17 + %s1694_s15]]  ;;  %s202_s6 = sshll.u32 %s190_s23, 4  ;;  %s1391_s6 = int_to_ptr.vmem [resolvable:$true] %s202_s6 }
  0x4b   : > { %p1384_p2 = pnand %p1673_p0, %p1668_p8  ;;  %p1675_p5 = pmov %p1673_p0 }
  0x4c   : > { %s1400_s1 = scalar_lea.sflag [#allocation10], %s186_s14 }
  0x4d   : > { %s1696_s24 = smov (!%p1675_p5, %s927_s24), [#allocation17]  ;;  %p1064_p7 = pneg %p1384_p2 }
  0x4e   : > { %s192_s9 = sld [smem:[%s1696_s24 + %s1694_s15]]  ;;  %s1067_s24 = scalar_lea.hbm %s1651_s4, 73728 }
  0x50   : > { %s919_s7 = smul.u32 192, %s191_s16 }
  0x54   : > { %s904_s12 = sshll.u32 %s192_s9, 1 }
  0x55   : > { %s199_s22 = sadd.s32 %s919_s7, %s904_s12 }
  0x56   : > { %s906_s18 = sshll.u32 %s199_s22, 7 }
  0x57   : > { %s1396_s11 = scalar_lea.hbm %s1651_s4, %s906_s18 }
  0x58   : > { %s1062_s17 = scalar_lea.hbm %s1396_s11, 8192  ;;  %p1068_p13 = scmp.lt.s32.totalorder %s1396_s11, %s1651_s4 }
  0x59   : > { %p1063_p12 = scmp.ne.s32.totalorder %s1396_s11, %s1062_s17  ;;  %p1069_p1 = scmp.lt.s32.totalorder %s1067_s24, %s1062_s17 }
  0x5b   : > { %p1065_p10 = pnand %p1064_p7, %p1063_p12  ;;  %p1070_p3 = por %p1069_p1, %p1068_p13 }
  0x5d   : > { %p1066_p11 = pneg %p1065_p10 }
  0x5f   : > { %p1071_p6 = pnand %p1070_p3, %p1066_p11 }
  0x61   : > { %1074 = shalt.err (!%p1071_p6)
}
  0x62   : > { %s1075_s14 = scalar_lea.vmem %s1391_s6, 8192  ;;  %s1187_s23 = smov [#allocation9]  }
  0x63   : > { %p1076_p8 = scmp.ne.s32.totalorder %s1391_s6, %s1075_s14  ;;  %s1080_s7 = sshll.u32 %s1187_s23, 4  ;;  %s1081_s7 = int_to_ptr.vmem [resolvable:$false] %s1080_s7 }
  0x64   : > { %s1082_s12 = scalar_lea.vmem %s1081_s7, 16384  ;;  %p1083_p0 = scmp.lt.s32.totalorder %s1391_s6, %s1081_s7 }
  0x65   : > { %p1078_p9 = pnand %p1076_p8, %p1064_p7  ;;  %p1084_p5 = scmp.lt.s32.totalorder %s1082_s12, %s1075_s14 }
  0x67   : > { %p1079_p4 = pneg %p1078_p9  ;;  %p1085_p12 = por %p1084_p5, %p1083_p0 }
  0x69   : > { %p1086_p10 = pnand %p1085_p12, %p1079_p4 }
  0x6b   : > { %1089 = shalt.err (!%p1086_p10)
}
  0x6c   : > { %s1188_s22 = smov 768   ;;  %s1189_s18 = smov 256  }
  0x6d   : > { %s1190_s20 = smov 16   ;;  %p1676_p7 = scmp.ne.s32.totalorder %s1667_s13, 0 }
  0x6e   : > { %948 = dma.hbm_to_vmem [thread:$0]  (!%p1384_p2), %s1396_s11, 8192, %s1391_s6, %s1400_s1, %s1188_s22, %s1189_s18, %s1190_s20  }
  0x6f   : > { %214 = sbr.rel (%p1676_p7) target bundleno = 571 (0x23b), region = 32  ;;  %s216_s28 = sand.u32 (!%p1676_p7), 1, %s1174_s27  }
  0x70   : > { %s1424_s17 = sshll.u32 (!%p1676_p7), %s216_s28, 1  ;;  %s217_s8 = scalar_lea.sflag (!%p1676_p7), [#allocation7], %s216_s28 }
  0x71   : > { %s220_s15 = scalar_lea.vmem (!%p1676_p7), [#allocation6], %s1424_s17  ;;  %p1677_p11 = scmp.ne.s32.totalorder (!%p1676_p7), %s1661_s10, 0 }
  0x74   : > { %1145 = dma.done.wait (%p1677_p11), %s217_s8, 32  }
  0x75   : > { %1147 = vsyncadd (%p1677_p11), %s217_s8, 4294967264  ;;  %s225_s21 = sand.u32 1, %s1162_s25   ;;  %p1678_p2 = scmp.ne.s32.totalorder %s1664_s19, 0 }
  0x76   : > { %s909_s6 = sshll.u32 %s225_s21, 9  ;;  %s226_s11 = scalar_lea.sflag [#allocation10], %s225_s21 }
  0x77   : > { %s1432_s13 = scalar_lea.vmem [#allocation9], %s909_s6 }
  0x78   : > { %1149 = dma.done.wait (%p1678_p2), %s226_s11, 8192  }
  0x79   : > { %1151 = vsyncadd (%p1678_p2), %s226_s11, 4294959104  ;;  %s258_s1 = sld [smem:[#allocation4 + %s1265_s30]]  ;;  %p912_p1 = scmp.ne.s32.totalorder %s1265_s30, 0 }
  0x7f   : > { %s910_s24 = sshll.u32 %s258_s1, 5 }
  0x80   : > { %p260_p13 = scmp.lt.s32.totalorder %s910_s24, 95  ;;  %275 = sbr.rel (%p912_p1) target bundleno = 139 (0x8b), region = 44 }
  0x82   : > { %s1698_s24 = smov (!%p260_p13, %s910_s24), 95 }
  0x83   : > { %s911_s16 = sshll.u32 %s1698_s24, 3 }
  0x84   : > { %s1442_s14 = scalar_lea.vmem %s1649_s2, %s911_s16 }
  0x85   : > { %vm284_vm0 = vcmask 0   ;;  %v1191_v0 = vmov 0.0  }
  0x86   : > { %276 = vst [vmem:[#allocation2 + $0x30] sm:$0xff] %v1191_v0  ;;  %277 = vst [vmem:[#allocation2] sm:$0xff] %v1191_v0 }
  0x87   : > { %278 = vst [vmem:[#allocation2 + $0x18] sm:$0xff] %v1191_v0  ;;  %279 = vst [vmem:[#allocation2 + $0x10] sm:$0xff] %v1191_v0 }
  0x88   : > { %280 = vst [vmem:[#allocation2 + $0x8] sm:$0xff] %v1191_v0  ;;  %281 = vst [vmem:[#allocation2 + $0x20] sm:$0xff] %v1191_v0 }
  0x89   : > { %282 = vst [vmem:[#allocation2 + $0x28] sm:$0xff] %v1191_v0  ;;  %283 = vst [vmem:[#allocation2 + $0x38] sm:$0xff] %v1191_v0 }
  0x8a   : > { %285 = vst.msk [vmem:[#allocation11] sm:$0x1] %vm284_vm0, %v1191_v0 }
  0x8b PF: > { %v303_v1 = vld [vmem:[%s1442_s14 + $0x10] sm:$0xff]  ;;  %v301_v2 = vld [vmem:[%s1442_s14] sm:$0xff]  ;;  %v1192_v3 = vmov 0   ;;  %v304_v4 = vld [vmem:[%s1442_s14 + $0x18] sm:$0xff]  ;;  %s286_s19 = sld [smem:[#allocation4 + %s1265_s30]]  ;;  %v334_v36 = vlaneseq  ;;  %p913_p6 = scmp.ne.s32.totalorder %s1265_s30, 5 }
  0x8c   : > { %1017 = vset.pattern.permute.xlu1 %v1192_v3  ;;  %1016 = vset.pattern.permute.xlu0 %v1192_v3  ;;  %v302_v5 = vld [vmem:[%s1442_s14 + $0x8] sm:$0xff]  ;;  %v360_v7 = vld [vmem:[%s1442_s14 + $0x20] sm:$0xff]  ;;  %v363_v8 = vld [vmem:[%s1442_s14 + $0x38] sm:$0xff]  ;;  %s287_s23 = sld [smem:[#allocation5 + %s1265_s30]] }
  0x8d   : > { %317 = vperm.xlu1 %1017, %v303_v1   ;;  %307 = vperm.xlu0 %1016, %v301_v2   ;;  %v361_v6 = vld [vmem:[%s1442_s14 + $0x28] sm:$0xff]  ;;  %v362_v9 = vld [vmem:[%s1442_s14 + $0x30] sm:$0xff]  ;;  %v416_v11 = vld [vmem:[%s1442_s14 + $0x40] sm:$0xff]  ;;  %v335_v39 = vshrl.u32 %v334_v36, 7 }
  0x8e   : > { %v417_v10 = vld [vmem:[%s1442_s14 + $0x48] sm:$0xff]  ;;  %v419_v12 = vld [vmem:[%s1442_s14 + $0x58] sm:$0xff]  ;;  %v418_v13 = vld [vmem:[%s1442_s14 + $0x50] sm:$0xff] }
  0x8f   : > { %v473_v14 = vld [vmem:[%s1442_s14 + $0x68] sm:$0xff]  ;;  %v472_v15 = vld [vmem:[%s1442_s14 + $0x60] sm:$0xff]  ;;  %v475_v16 = vld [vmem:[%s1442_s14 + $0x78] sm:$0xff]  ;;  %v336_v44 = vsub.s32 0, %v335_v39  ;;  %v340_v45 = vsub.s32 1, %v335_v39 }
  0x90   : > { %v474_v17 = vld [vmem:[%s1442_s14 + $0x70] sm:$0xff]  ;;  %v529_v18 = vld [vmem:[%s1442_s14 + $0x88] sm:$0xff]  ;;  %v528_v19 = vld [vmem:[%s1442_s14 + $0x80] sm:$0xff] }
  0x91   : > { %322 = vperm.xlu1 %1017, %v304_v4   ;;  %312 = vperm.xlu0 %1016, %v302_v5   ;;  %v531_v20 = vld [vmem:[%s1442_s14 + $0x98] sm:$0xff]  ;;  %v530_v21 = vld [vmem:[%s1442_s14 + $0x90] sm:$0xff]  ;;  %v585_v22 = vld [vmem:[%s1442_s14 + $0xa8] sm:$0xff] }
  0x92   : > { %v584_v23 = vld [vmem:[%s1442_s14 + $0xa0] sm:$0xff]  ;;  %v587_v24 = vld [vmem:[%s1442_s14 + $0xb8] sm:$0xff]  ;;  %v586_v25 = vld [vmem:[%s1442_s14 + $0xb0] sm:$0xff]  ;;  %p288_p3 = scmp.eq.s32.totalorder %s286_s19, %s287_s23 }
  0x93   : > { %v641_v26 = vld [vmem:[%s1442_s14 + $0xc8] sm:$0xff]  ;;  %v640_v27 = vld [vmem:[%s1442_s14 + $0xc0] sm:$0xff]  ;;  %v643_v28 = vld [vmem:[%s1442_s14 + $0xd8] sm:$0xff] }
  0x94   : > { %v642_v29 = vld [vmem:[%s1442_s14 + $0xd0] sm:$0xff]  ;;  %v697_v30 = vld [vmem:[%s1442_s14 + $0xe8] sm:$0xff]  ;;  %v696_v31 = vld [vmem:[%s1442_s14 + $0xe0] sm:$0xff]  ;;  %s289_s7 = scalar_select %p288_p3, 1.0, 2.0 }
  0x95   : > { %371 = vperm.xlu1 %1017, %v361_v6   ;;  %366 = vperm.xlu0 %1016, %v360_v7   ;;  %v699_v32 = vld [vmem:[%s1442_s14 + $0xf8] sm:$0xff]  ;;  %v698_v33 = vld [vmem:[%s1442_s14 + $0xf0] sm:$0xff]  ;;  %v290_v42 = vld [vmem:[%s220_s15] sm:$0x3] }
  0x96   : > { %v291_v43 = vstv %s289_s7  ;;  %v297_v49 = vld [vmem:[%s1432_s13 + $0x20] sm:$0xff]  ;;  %v298_v50 = vld [vmem:[%s1432_s13 + $0x28] sm:$0xff]  ;;  %v354_v55 = vld [vmem:[%s1432_s13 + $0x50] sm:$0xff] }
  0x97   : > { %v292_v46 = vmul.f32 %v291_v43, %v290_v42  ;;  %v293_v51 = vld [vmem:[%s1432_s13] sm:$0xff]  ;;  %v294_v52 = vld [vmem:[%s1432_s13 + $0x8] sm:$0xff]  ;;  %v355_v62 = vld [vmem:[%s1432_s13 + $0x58] sm:$0xff] }
  0x98   : > { %v352_v63 = vld [vmem:[%s1432_s13 + $0x40] sm:$0xff]  ;;  %v353_v0 = vld [vmem:[%s1432_s13 + $0x48] sm:$0xff]  ;;  %v299_v1 = vld [vmem:[%s1432_s13 + $0x30] sm:$0xff] }
  0x99   : > { %381 = vperm.xlu1 %1017, %v363_v8   ;;  %376 = vperm.xlu0 %1016, %v362_v9   ;;  %v1485_v53 = vrot.slane %v292_v46, %v336_v44  ;;  %v1487_v54 = vrot.slane %v292_v46, %v340_v45  ;;  %v300_v2 = vld [vmem:[%s1432_s13 + $0x38] sm:$0xff]  ;;  %v295_v3 = vld [vmem:[%s1432_s13 + $0x10] sm:$0xff] }
  0x9a   : > { %v296_v4 = vld [vmem:[%s1432_s13 + $0x18] sm:$0xff]  ;;  %v358_v5 = vld [vmem:[%s1432_s13 + $0x70] sm:$0xff] }
  0x9b   : > { %v414_v45 = vld [vmem:[%s1432_s13 + $0xb0] sm:$0xff] }
  0x9d   : > { %427 = vperm.xlu1 %1017, %v417_v10   ;;  %422 = vperm.xlu0 %1016, %v416_v11   ;;  %v359_v10 = vld [vmem:[%s1432_s13 + $0x78] sm:$0xff]  ;;  %v356_v11 = vld [vmem:[%s1432_s13 + $0x60] sm:$0xff] }
  0xa1   : > { %437 = vperm.xlu1 %1017, %v419_v12   ;;  %432 = vperm.xlu0 %1016, %v418_v13   ;;  %v357_v12 = vld [vmem:[%s1432_s13 + $0x68] sm:$0xff] }
  0xa5   : > { %483 = vperm.xlu1 %1017, %v473_v14   ;;  %478 = vperm.xlu0 %1016, %v472_v15  }
  0xa9   : > { %493 = vperm.xlu1 %1017, %v475_v16   ;;  %488 = vperm.xlu0 %1016, %v474_v17  }
  0xad   : > { %539 = vperm.xlu1 %1017, %v529_v18   ;;  %534 = vperm.xlu0 %1016, %v528_v19   ;;  %v410_v19 = vld [vmem:[%s1432_s13 + $0x90] sm:$0xff] }
  0xb1   : > { %549 = vperm.xlu1 %1017, %v531_v20   ;;  %544 = vperm.xlu0 %1016, %v530_v21  }
  0xb5   : > { %595 = vperm.xlu1 %1017, %v585_v22   ;;  %590 = vperm.xlu0 %1016, %v584_v23  }
  0xb9   : > { %605 = vperm.xlu1 %1017, %v587_v24   ;;  %600 = vperm.xlu0 %1016, %v586_v25   ;;  %v411_v24 = vld [vmem:[%s1432_s13 + $0x98] sm:$0xff]  ;;  %v408_v25 = vld [vmem:[%s1432_s13 + $0x80] sm:$0xff] }
  0xbd   : > { %651 = vperm.xlu1 %1017, %v641_v26   ;;  %646 = vperm.xlu0 %1016, %v640_v27   ;;  %v409_v26 = vld [vmem:[%s1432_s13 + $0x88] sm:$0xff] }
  0xc1   : > { %661 = vperm.xlu1 %1017, %v643_v28   ;;  %656 = vperm.xlu0 %1016, %v642_v29  }
  0xc5   : > { %707 = vperm.xlu1 %1017, %v697_v30   ;;  %702 = vperm.xlu0 %1016, %v696_v31  }
  0xc9   : > { %717 = vperm.xlu1 %1017, %v699_v32   ;;  %712 = vperm.xlu0 %1016, %v698_v33  }
 0x108   : > { %v318_v34 = vpop.permute.xlu1 %317  ;;  %v308_v35 = vpop.permute.xlu0 %307 }
 0x109   : > { %v329_v58 = vmul.f32 %v318_v34, %v297_v49  ;;  %v330_v59 = vmul.f32 %v318_v34, %v298_v50  ;;  %v325_v60 = vmul.f32 %v308_v35, %v293_v51  ;;  %v326_v61 = vmul.f32 %v308_v35, %v294_v52  ;;  %v415_v50 = vld [vmem:[%s1432_s13 + $0xb8] sm:$0xff]  ;;  %v412_v51 = vld [vmem:[%s1432_s13 + $0xa0] sm:$0xff]  ;;  %v413_v52 = vld [vmem:[%s1432_s13 + $0xa8] sm:$0xff] }
 0x10b   : > { %v348_v15 = vmul.f32 %v1485_v53, %v329_v58  ;;  %v349_v16 = vmul.f32 %v1487_v54, %v330_v59  ;;  %v344_v17 = vmul.f32 %v1485_v53, %v325_v60  ;;  %v345_v18 = vmul.f32 %v1487_v54, %v326_v61  ;;  %v466_v59 = vld [vmem:[%s1432_s13 + $0xd0] sm:$0xff] }
 0x10c   : > { %v323_v37 = vpop.permute.xlu1 %322  ;;  %v313_v38 = vpop.permute.xlu0 %312 }
 0x10d   : > { %v331_v20 = vmul.f32 %v323_v37, %v299_v1  ;;  %v332_v21 = vmul.f32 %v323_v37, %v300_v2  ;;  %v327_v22 = vmul.f32 %v313_v38, %v295_v3  ;;  %v328_v23 = vmul.f32 %v313_v38, %v296_v4  ;;  %v467_v2 = vld [vmem:[%s1432_s13 + $0xd8] sm:$0xff]  ;;  %v464_v3 = vld [vmem:[%s1432_s13 + $0xc0] sm:$0xff]  ;;  %v465_v4 = vld [vmem:[%s1432_s13 + $0xc8] sm:$0xff] }
 0x10f   : > { %v351_v42 = vmul.f32 %v1487_v54, %v332_v21  ;;  %v346_v43 = vmul.f32 %v1485_v53, %v327_v22  ;;  %v347_v44 = vmul.f32 %v1487_v54, %v328_v23  ;;  %v471_v22 = vld [vmem:[%s1432_s13 + $0xf8] sm:$0xff]  ;;  %v468_v23 = vld [vmem:[%s1432_s13 + $0xe0] sm:$0xff] }
 0x110   : > { %v372_v40 = vpop.permute.xlu1 %371  ;;  %v367_v41 = vpop.permute.xlu0 %366 }
 0x111   : > { %v386_v6 = vmul.f32 %v372_v40, %v354_v55  ;;  %v387_v7 = vmul.f32 %v372_v40, %v355_v62  ;;  %v384_v8 = vmul.f32 %v367_v41, %v352_v63  ;;  %v385_v9 = vmul.f32 %v367_v41, %v353_v0 }
 0x112   : > { %v350_v41 = vmul.f32 %v1485_v53, %v331_v20 }
 0x113   : > { %v394_v31 = vmul.f32 %v386_v6, %v1485_v53  ;;  %v395_v32 = vmul.f32 %v387_v7, %v1487_v54  ;;  %v392_v33 = vmul.f32 %v384_v8, %v1485_v53  ;;  %v393_v34 = vmul.f32 %v385_v9, %v1487_v54 }
 0x114   : > { %v382_v47 = vpop.permute.xlu1 %381  ;;  %v377_v48 = vpop.permute.xlu0 %376 }
 0x115   : > { %v390_v27 = vmul.f32 %v382_v47, %v358_v5  ;;  %v391_v28 = vmul.f32 %v382_v47, %v359_v10  ;;  %v388_v29 = vmul.f32 %v377_v48, %v356_v11  ;;  %v389_v30 = vmul.f32 %v377_v48, %v357_v12 }
 0x116   : > { %v402_v55 = vadd.f32 %v394_v31, %v346_v43  ;;  %v401_v58 = vadd.f32 %v393_v34, %v345_v18  ;;  %v521_v34 = vld [vmem:[%s1432_s13 + $0x108] sm:$0xff] }
 0x117   : > { %v398_v46 = vmul.f32 %v390_v27, %v1485_v53  ;;  %v399_v47 = vmul.f32 %v391_v28, %v1487_v54  ;;  %v396_v48 = vmul.f32 %v388_v29, %v1485_v53  ;;  %v397_v49 = vmul.f32 %v389_v30, %v1487_v54 }
 0x118   : > { %v428_v56 = vpop.permute.xlu1 %427  ;;  %v423_v57 = vpop.permute.xlu0 %422 }
 0x119   : > { %v442_v37 = vmul.f32 %v428_v56, %v410_v19  ;;  %v443_v38 = vmul.f32 %v428_v56, %v411_v24  ;;  %v440_v39 = vmul.f32 %v423_v57, %v408_v25  ;;  %v441_v40 = vmul.f32 %v423_v57, %v409_v26  ;;  %v469_v24 = vld [vmem:[%s1432_s13 + $0xe8] sm:$0xff] }
 0x11a   : > { %v403_v56 = vadd.f32 %v395_v32, %v347_v44  ;;  %v400_v57 = vadd.f32 %v392_v33, %v344_v17  ;;  %v406_v9 = vadd.f32 %v398_v46, %v350_v41  ;;  %v407_v10 = vadd.f32 %v399_v47, %v351_v42  ;;  %v470_v17 = vld [vmem:[%s1432_s13 + $0xf0] sm:$0xff]  ;;  %v523_v32 = vld [vmem:[%s1432_s13 + $0x118] sm:$0xff]  ;;  %v520_v33 = vld [vmem:[%s1432_s13 + $0x100] sm:$0xff] }
 0x11b   : > { %v450_v62 = vmul.f32 %v442_v37, %v1485_v53  ;;  %v451_v63 = vmul.f32 %v443_v38, %v1487_v54  ;;  %v448_v0 = vmul.f32 %v440_v39, %v1485_v53  ;;  %v449_v1 = vmul.f32 %v441_v40, %v1487_v54 }
 0x11c   : > { %v438_v13 = vpop.permute.xlu1 %437  ;;  %v433_v14 = vpop.permute.xlu0 %432  ;;  %v404_v11 = vadd.f32 %v396_v48, %v348_v15  ;;  %v405_v12 = vadd.f32 %v397_v49, %v349_v16  ;;  %v522_v15 = vld [vmem:[%s1432_s13 + $0x110] sm:$0xff] }
 0x11d   : > { %v446_v5 = vmul.f32 %v438_v13, %v414_v45  ;;  %v447_v6 = vmul.f32 %v438_v13, %v415_v50  ;;  %v444_v7 = vmul.f32 %v433_v14, %v412_v51  ;;  %v445_v8 = vmul.f32 %v433_v14, %v413_v52 }
 0x11e   : > { %v458_v26 = vadd.f32 %v450_v62, %v402_v55  ;;  %v459_v14 = vadd.f32 %v451_v63, %v403_v56  ;;  %v456_v27 = vadd.f32 %v448_v0, %v400_v57  ;;  %v457_v28 = vadd.f32 %v449_v1, %v401_v58  ;;  %v526_v55 = vld [vmem:[%s1432_s13 + $0x130] sm:$0xff]  ;;  %v525_v62 = vld [vmem:[%s1432_s13 + $0x128] sm:$0xff] }
 0x11f   : > { %v454_v16 = vmul.f32 %v446_v5, %v1485_v53  ;;  %v455_v29 = vmul.f32 %v447_v6, %v1487_v54  ;;  %v452_v30 = vmul.f32 %v444_v7, %v1485_v53  ;;  %v453_v31 = vmul.f32 %v445_v8, %v1487_v54 }
 0x120   : > { %v484_v35 = vpop.permute.xlu1 %483  ;;  %v479_v36 = vpop.permute.xlu0 %478 }
 0x121   : > { %v498_v18 = vmul.f32 %v484_v35, %v466_v59  ;;  %v499_v19 = vmul.f32 %v484_v35, %v467_v2  ;;  %v496_v20 = vmul.f32 %v479_v36, %v464_v3  ;;  %v497_v21 = vmul.f32 %v479_v36, %v465_v4  ;;  %v578_v3 = vld [vmem:[%s1432_s13 + $0x150] sm:$0xff] }
 0x122   : > { %v462_v49 = vadd.f32 %v454_v16, %v406_v9  ;;  %v463_v50 = vadd.f32 %v455_v29, %v407_v10  ;;  %v460_v51 = vadd.f32 %v452_v30, %v404_v11  ;;  %v461_v52 = vadd.f32 %v453_v31, %v405_v12  ;;  %v579_v10 = vld [vmem:[%s1432_s13 + $0x158] sm:$0xff]  ;;  %v576_v11 = vld [vmem:[%s1432_s13 + $0x140] sm:$0xff]  ;;  %v577_v12 = vld [vmem:[%s1432_s13 + $0x148] sm:$0xff] }
 0x123   : > { %v506_v39 = vmul.f32 %v498_v18, %v1485_v53  ;;  %v507_v40 = vmul.f32 %v499_v19, %v1487_v54  ;;  %v504_v41 = vmul.f32 %v496_v20, %v1485_v53  ;;  %v505_v42 = vmul.f32 %v497_v21, %v1487_v54  ;;  %v580_v16 = vld [vmem:[%s1432_s13 + $0x160] sm:$0xff]  ;;  %v581_v29 = vld [vmem:[%s1432_s13 + $0x168] sm:$0xff] }
 0x124   : > { %v494_v60 = vpop.permute.xlu1 %493  ;;  %v489_v61 = vpop.permute.xlu0 %488 }
 0x125   : > { %v502_v35 = vmul.f32 %v494_v60, %v470_v17  ;;  %v503_v36 = vmul.f32 %v494_v60, %v471_v22  ;;  %v500_v37 = vmul.f32 %v489_v61, %v468_v23  ;;  %v501_v38 = vmul.f32 %v489_v61, %v469_v24  ;;  %v527_v60 = vld [vmem:[%s1432_s13 + $0x138] sm:$0xff]  ;;  %v524_v61 = vld [vmem:[%s1432_s13 + $0x120] sm:$0xff] }
 0x126   : > { %v514_v63 = vadd.f32 %v506_v39, %v458_v26  ;;  %v515_v0 = vadd.f32 %v507_v40, %v459_v14  ;;  %v512_v1 = vadd.f32 %v504_v41, %v456_v27  ;;  %v513_v2 = vadd.f32 %v505_v42, %v457_v28  ;;  %v583_v28 = vld [vmem:[%s1432_s13 + $0x178] sm:$0xff]  ;;  %v632_v41 = vld [vmem:[%s1432_s13 + $0x180] sm:$0xff]  ;;  %v633_v42 = vld [vmem:[%s1432_s13 + $0x188] sm:$0xff] }
 0x127   : > { %v510_v56 = vmul.f32 %v502_v35, %v1485_v53  ;;  %v511_v57 = vmul.f32 %v503_v36, %v1487_v54  ;;  %v508_v58 = vmul.f32 %v500_v37, %v1485_v53  ;;  %v509_v59 = vmul.f32 %v501_v38, %v1487_v54  ;;  %v634_v35 = vld [vmem:[%s1432_s13 + $0x190] sm:$0xff]  ;;  %v635_v40 = vld [vmem:[%s1432_s13 + $0x198] sm:$0xff] }
 0x128   : > { %v540_v25 = vpop.permute.xlu1 %539  ;;  %v535_v13 = vpop.permute.xlu0 %534 }
 0x129   : > { %v554_v45 = vmul.f32 %v540_v25, %v522_v15  ;;  %v555_v46 = vmul.f32 %v540_v25, %v523_v32  ;;  %v552_v47 = vmul.f32 %v535_v13, %v520_v33  ;;  %v553_v48 = vmul.f32 %v535_v13, %v521_v34  ;;  %v582_v25 = vld [vmem:[%s1432_s13 + $0x170] sm:$0xff] }
 0x12a   : > { %v518_v21 = vadd.f32 %v510_v56, %v462_v49  ;;  %v519_v22 = vadd.f32 %v511_v57, %v463_v50  ;;  %v516_v23 = vadd.f32 %v508_v58, %v460_v51  ;;  %v517_v24 = vadd.f32 %v509_v59, %v461_v52 }
 0x12b   : > { %v562_v6 = vmul.f32 %v554_v45, %v1485_v53  ;;  %v563_v7 = vmul.f32 %v555_v46, %v1487_v54  ;;  %v560_v8 = vmul.f32 %v552_v47, %v1485_v53  ;;  %v561_v9 = vmul.f32 %v553_v48, %v1487_v54 }
 0x12c   : > { %v550_v43 = vpop.permute.xlu1 %549  ;;  %v545_v44 = vpop.permute.xlu0 %544 }
 0x12d   : > { %v558_v17 = vmul.f32 %v550_v43, %v526_v55  ;;  %v559_v18 = vmul.f32 %v550_v43, %v527_v60  ;;  %v556_v19 = vmul.f32 %v545_v44, %v524_v61  ;;  %v557_v20 = vmul.f32 %v545_v44, %v525_v62 }
 0x12e   : > { %v570_v31 = vadd.f32 %v562_v6, %v514_v63  ;;  %v571_v32 = vadd.f32 %v563_v7, %v515_v0  ;;  %v568_v33 = vadd.f32 %v560_v8, %v512_v1  ;;  %v569_v34 = vadd.f32 %v561_v9, %v513_v2  ;;  %v638_v63 = vld [vmem:[%s1432_s13 + $0x1b0] sm:$0xff]  ;;  %v637_v6 = vld [vmem:[%s1432_s13 + $0x1a8] sm:$0xff] }
 0x12f   : > { %v566_v36 = vmul.f32 %v558_v17, %v1485_v53  ;;  %v567_v37 = vmul.f32 %v559_v18, %v1487_v54  ;;  %v564_v38 = vmul.f32 %v556_v19, %v1485_v53  ;;  %v565_v39 = vmul.f32 %v557_v20, %v1487_v54 }
 0x130   : > { %v596_v4 = vpop.permute.xlu1 %595  ;;  %v591_v5 = vpop.permute.xlu0 %590 }
 0x131   : > { %v610_v13 = vmul.f32 %v596_v4, %v578_v3  ;;  %v611_v26 = vmul.f32 %v596_v4, %v579_v10  ;;  %v608_v14 = vmul.f32 %v591_v5, %v576_v11  ;;  %v609_v27 = vmul.f32 %v591_v5, %v577_v12  ;;  %v639_v4 = vld [vmem:[%s1432_s13 + $0x1b8] sm:$0xff]  ;;  %v636_v5 = vld [vmem:[%s1432_s13 + $0x1a0] sm:$0xff] }
 0x132   : > { %v574_v59 = vadd.f32 %v566_v36, %v518_v21  ;;  %v575_v60 = vadd.f32 %v567_v37, %v519_v22  ;;  %v572_v61 = vadd.f32 %v564_v38, %v516_v23  ;;  %v573_v62 = vadd.f32 %v565_v39, %v517_v24  ;;  %v690_v21 = vld [vmem:[%s1432_s13 + $0x1d0] sm:$0xff] }
 0x133   : > { %v618_v47 = vmul.f32 %v610_v13, %v1485_v53  ;;  %v619_v48 = vmul.f32 %v611_v26, %v1487_v54  ;;  %v616_v49 = vmul.f32 %v608_v14, %v1485_v53  ;;  %v617_v50 = vmul.f32 %v609_v27, %v1487_v54  ;;  %v691_v13 = vld [vmem:[%s1432_s13 + $0x1d8] sm:$0xff]  ;;  %v688_v26 = vld [vmem:[%s1432_s13 + $0x1c0] sm:$0xff]  ;;  %v689_v14 = vld [vmem:[%s1432_s13 + $0x1c8] sm:$0xff] }
 0x134   : > { %v606_v15 = vpop.permute.xlu1 %605  ;;  %v601_v30 = vpop.permute.xlu0 %600 }
 0x135   : > { %v614_v43 = vmul.f32 %v606_v15, %v582_v25  ;;  %v615_v44 = vmul.f32 %v606_v15, %v583_v28  ;;  %v612_v45 = vmul.f32 %v601_v30, %v580_v16  ;;  %v613_v46 = vmul.f32 %v601_v30, %v581_v29 }
 0x136   : > { %v626_v7 = vadd.f32 %v618_v47, %v570_v31  ;;  %v627_v8 = vadd.f32 %v619_v48, %v571_v32  ;;  %v624_v9 = vadd.f32 %v616_v49, %v568_v33  ;;  %v625_v10 = vadd.f32 %v617_v50, %v569_v34  ;;  %v695_v49 = vld [vmem:[%s1432_s13 + $0x1f8] sm:$0xff]  ;;  %v692_v50 = vld [vmem:[%s1432_s13 + $0x1e0] sm:$0xff] }
 0x137   : > { %v622_v0 = vmul.f32 %v614_v43, %v1485_v53  ;;  %v623_v1 = vmul.f32 %v615_v44, %v1487_v54  ;;  %v620_v2 = vmul.f32 %v612_v45, %v1485_v53  ;;  %v621_v3 = vmul.f32 %v613_v46, %v1487_v54  ;;  %v746_v43 = vld [vmem:[#allocation2 + $0x18] sm:$0xff] }
 0x138   : > { %v652_v51 = vpop.permute.xlu1 %651  ;;  %v647_v52 = vpop.permute.xlu0 %646  ;;  %v694_v44 = vld [vmem:[%s1432_s13 + $0x1f0] sm:$0xff] }
 0x139   : > { %v666_v55 = vmul.f32 %v652_v51, %v634_v35  ;;  %v667_v56 = vmul.f32 %v652_v51, %v635_v40  ;;  %v664_v57 = vmul.f32 %v647_v52, %v632_v41  ;;  %v665_v58 = vmul.f32 %v647_v52, %v633_v42  ;;  %v693_v51 = vld [vmem:[%s1432_s13 + $0x1e8] sm:$0xff] }
 0x13a   : > { %v630_v27 = vadd.f32 %v622_v0, %v574_v59  ;;  %v631_v28 = vadd.f32 %v623_v1, %v575_v60  ;;  %v628_v15 = vadd.f32 %v620_v2, %v572_v61  ;;  %v629_v16 = vadd.f32 %v621_v3, %v573_v62  ;;  %v744_v59 = vld [vmem:[#allocation2 + $0x30] sm:$0xff]  ;;  %v745_v60 = vld [vmem:[#allocation2] sm:$0xff] }
 0x13b   : > { %v674_v17 = vmul.f32 %v666_v55, %v1485_v53  ;;  %v675_v18 = vmul.f32 %v667_v56, %v1487_v54  ;;  %v672_v19 = vmul.f32 %v664_v57, %v1485_v53  ;;  %v673_v20 = vmul.f32 %v665_v58, %v1487_v54  ;;  %v747_v58 = vld [vmem:[#allocation2 + $0x10] sm:$0xff] }
 0x13c   : > { %v662_v11 = vpop.permute.xlu1 %661  ;;  %v657_v12 = vpop.permute.xlu0 %656 }
 0x13d   : > { %v670_v22 = vmul.f32 %v662_v11, %v638_v63  ;;  %v671_v23 = vmul.f32 %v662_v11, %v639_v4  ;;  %v668_v24 = vmul.f32 %v657_v12, %v636_v5  ;;  %v669_v25 = vmul.f32 %v657_v12, %v637_v6  ;;  %v750_v11 = vld [vmem:[#allocation2 + $0x28] sm:$0xff] }
 0x13e   : > { %v682_v39 = vadd.f32 %v674_v17, %v626_v7  ;;  %v683_v40 = vadd.f32 %v675_v18, %v627_v8  ;;  %v680_v41 = vadd.f32 %v672_v19, %v624_v9  ;;  %v681_v42 = vadd.f32 %v673_v20, %v625_v10  ;;  %v751_v20 = vld [vmem:[#allocation2 + $0x38] sm:$0xff] }
 0x13f   : > { %v678_v29 = vmul.f32 %v670_v22, %v1485_v53  ;;  %v679_v30 = vmul.f32 %v671_v23, %v1487_v54  ;;  %v676_v31 = vmul.f32 %v668_v24, %v1485_v53  ;;  %v677_v32 = vmul.f32 %v669_v25, %v1487_v54  ;;  %v749_v22 = vld [vmem:[#allocation2 + $0x20] sm:$0xff] }
 0x140   : > { %v708_v33 = vpop.permute.xlu1 %707  ;;  %v703_v34 = vpop.permute.xlu0 %702 }
 0x141   : > { %v722_v35 = vmul.f32 %v708_v33, %v690_v21  ;;  %v723_v36 = vmul.f32 %v708_v33, %v691_v13  ;;  %v720_v37 = vmul.f32 %v703_v34, %v688_v26  ;;  %v721_v38 = vmul.f32 %v703_v34, %v689_v14  ;;  %v748_v21 = vld [vmem:[#allocation2 + $0x8] sm:$0xff] }
 0x142   : > { %v686_v52 = vadd.f32 %v678_v29, %v630_v27  ;;  %v687_v55 = vadd.f32 %v679_v30, %v631_v28  ;;  %v684_v56 = vadd.f32 %v676_v31, %v628_v15  ;;  %v685_v57 = vadd.f32 %v677_v32, %v629_v16 }
 0x143   : > { %v730_v45 = vmul.f32 %v722_v35, %v1485_v53  ;;  %v731_v46 = vmul.f32 %v723_v36, %v1487_v54  ;;  %v728_v47 = vmul.f32 %v720_v37, %v1485_v53  ;;  %v729_v48 = vmul.f32 %v721_v38, %v1487_v54 }
 0x144   : > { %v718_v61 = vpop.permute.xlu1 %717  ;;  %v713_v62 = vpop.permute.xlu0 %712 }
 0x145   : > { %v738_v63 = vadd.f32 %v730_v45, %v682_v39  ;;  %v739_v0 = vadd.f32 %v731_v46, %v683_v40  ;;  %v736_v1 = vadd.f32 %v728_v47, %v680_v41  ;;  %v737_v2 = vadd.f32 %v729_v48, %v681_v42 }
 0x146   : > { %v726_v3 = vmul.f32 %v718_v61, %v694_v44  ;;  %v727_v4 = vmul.f32 %v718_v61, %v695_v49  ;;  %v724_v5 = vmul.f32 %v713_v62, %v692_v50  ;;  %v725_v6 = vmul.f32 %v713_v62, %v693_v51 }
 0x147   : > { %v754_v7 = vadd.f32 %v746_v43, %v738_v63  ;;  %v755_v8 = vadd.f32 %v747_v58, %v739_v0  ;;  %v752_v9 = vadd.f32 %v744_v59, %v736_v1  ;;  %v753_v10 = vadd.f32 %v745_v60, %v737_v2 }
 0x148   : > { %v734_v12 = vmul.f32 %v726_v3, %v1485_v53  ;;  %v735_v17 = vmul.f32 %v727_v4, %v1487_v54  ;;  %v732_v18 = vmul.f32 %v724_v5, %v1485_v53  ;;  %v733_v19 = vmul.f32 %v725_v6, %v1487_v54 }
 0x149   : > { %762 = vst [vmem:[#allocation2 + $0x18] sm:$0xff] %v754_v7  ;;  %763 = vst [vmem:[#allocation2 + $0x10] sm:$0xff] %v755_v8 }
 0x14a   : > { %760 = vst [vmem:[#allocation2 + $0x30] sm:$0xff] %v752_v9  ;;  %761 = vst [vmem:[#allocation2] sm:$0xff] %v753_v10  ;;  %v742_v23 = vadd.f32 %v734_v12, %v686_v52  ;;  %v743_v24 = vadd.f32 %v735_v17, %v687_v55  ;;  %v740_v25 = vadd.f32 %v732_v18, %v684_v56 }
 0x14b   : > { %v741_v13 = vadd.f32 %v733_v19, %v685_v57  ;;  %771 = sbr.rel (%p913_p6) target bundleno = 556 (0x22c), region = 48 }
 0x14c   : > { %v758_v26 = vadd.f32 %v750_v11, %v742_v23  ;;  %v759_v14 = vadd.f32 %v751_v20, %v743_v24  ;;  %v756_v27 = vadd.f32 %v748_v21, %v740_v25 }
 0x14d   : > { %v757_v28 = vadd.f32 %v749_v22, %v741_v13 }
 0x14e   : > { %766 = vst [vmem:[#allocation2 + $0x28] sm:$0xff] %v758_v26  ;;  %767 = vst [vmem:[#allocation2 + $0x38] sm:$0xff] %v759_v14 }
 0x14f   : > { %764 = vst [vmem:[#allocation2 + $0x8] sm:$0xff] %v756_v27  ;;  %765 = vst [vmem:[#allocation2 + $0x20] sm:$0xff] %v757_v28 }
 0x150   : > { %v774_v15 = vld [vmem:[#allocation2 + $0x18] sm:$0xff]  ;;  %v775_v29 = vld [vmem:[#allocation2 + $0x10] sm:$0xff]  ;;  %v796_v47 = vld [vmem:[#allocation11] sm:$0x1]  ;;  %vm799_vm1 = vcmask 0  }
 0x151   : > { %v772_v53 = vld [vmem:[#allocation2 + $0x30] sm:$0xff]  ;;  %v773_v54 = vld [vmem:[#allocation2] sm:$0xff] }
 0x152   : > { %v780_v16 = vadd.f32 %v773_v54, %v772_v53 }
 0x154   : > { %v781_v30 = vadd.f32 %v780_v16, %v774_v15 }
 0x155   : > { %v778_v35 = vld [vmem:[#allocation2 + $0x28] sm:$0xff]  ;;  %v779_v37 = vld [vmem:[#allocation2 + $0x38] sm:$0xff] }
 0x156   : > { %v776_v31 = vld [vmem:[#allocation2 + $0x8] sm:$0xff]  ;;  %v782_v32 = vadd.f32 %v781_v30, %v775_v29  ;;  %v777_v33 = vld [vmem:[#allocation2 + $0x20] sm:$0xff] }
 0x158   : > { %v783_v34 = vadd.f32 %v782_v32, %v776_v31 }
 0x15a   : > { %v784_v36 = vadd.f32 %v783_v34, %v777_v33 }
 0x15c   : > { %v785_v38 = vadd.f32 %v784_v36, %v778_v35 }
 0x15e   : > { %v786_v39 = vadd.f32 %v785_v38, %v779_v37 }
 0x160   : > { %787 = vadd.xlane.f32.xlu0 %v786_v39 }
 0x1e9   : > { %v788_v40 = vpop.xlane.xlu0 %787 }
 0x1ea   : > { %v789_v41 = vrot.slane %v788_v40, 4 }
 0x1ec   : > { %v790_v42 = vadd.f32 %v789_v41, %v788_v40 }
 0x1ee   : > { %v791_v43 = vrot.slane %v790_v42, 2 }
 0x1f0   : > { %v792_v44 = vadd.f32 %v791_v43, %v790_v42 }
 0x1f2   : > { %v793_v45 = vrot.slane %v792_v44, 1 }
 0x1f4   : > { %v794_v46 = vadd.f32 %v793_v45, %v792_v44 }
 0x1f6   : > { %920 = vpush %v794_v46 }
 0x227   : > { %s921_s12 = spop %920 }
 0x228   : > { %v797_v48 = vstv %s921_s12 }
 0x229   : > { %v798_v49 = vadd.f32 %v797_v48, %v796_v47 }
 0x22b   : > { %800 = vst.msk [vmem:[#allocation11] sm:$0x1] %vm799_vm1, %v798_v49 }
 0x22c PF: > { %p950_p8 = scmp.eq.s32.totalorder %s1265_s30, 5  ;;  %s1193_s22 = smov [#allocation11]  }
 0x22d   : > { %s808_s18 = sshll.u32 %s1193_s22, 4  ;;  %s809_s18 = int_to_ptr.vmem [resolvable:$true] %s808_s18 }
 0x22e   : > { %s1090_s20 = scalar_lea.vmem %s809_s18, 16  ;;  %s1096_s28 = scalar_lea.vmem %s809_s18, 32 }
 0x22f   : > { %p1091_p9 = scmp.ne.s32.totalorder %s809_s18, %s1090_s20  ;;  %p1097_p5 = scmp.lt.s32.totalorder %s809_s18, %s809_s18 }
 0x230   : > { %p1098_p12 = scmp.lt.s32.totalorder %s1096_s28, %s1090_s20 }
 0x231   : > { %p1092_p4 = pnand %p1091_p9, %p950_p8 }
 0x232   : > { %p1099_p10 = por %p1098_p12, %p1097_p5 }
 0x233   : > { %p1093_p0 = pneg %p1092_p4 }
 0x235   : > { %p1100_p7 = pnand %p1099_p10, %p1093_p0 }
 0x237   : > { %1103 = shalt.err (!%p1100_p7)
}
 0x238   : > { %933 = dma.vmem_to_hbm [thread:$0]  (%p950_p8), %s809_s18, 16, %s1652_s5, [#allocation8]  }
 0x239   : > { %1153 = dma.done.wait (%p950_p8), [#allocation8], 16  }
 0x23a   : > { %1155 = vsyncadd (%p950_p8), [#allocation8], 4294967280 }
 0x23b PF: > { %s1679_s15 = sld [smem:[#allocation22_spill]]  ;;  %p25_p11 = scmp.ge.s32.totalorder %s1262_s29, 8  }
 0x23c   : > { %s1680_s28 = sld [smem:[#allocation23_spill]]  ;;  %s1681_s24 = smov %s1162_s25 }
 0x23d   : > { %s1682_s25 = smov %s1166_s26  ;;  %s1683_s26 = smov %s1315_s0 }
 0x23e   : > { %s1684_s0 = smov %s1174_s27  ;;  %s1686_s1 = smov %s1262_s29 }
 0x23f   :  { %27 = sbr.rel (!%p25_p11) target bundleno = 14 (0xe), region = 93 }
 0x241   : > { %s1685_s27 = smov %s1679_s15 }
 0x244   :  { %821 = vsyncpa [#allocation7], 1 }
 0x245   :  { %823 = vsyncpa [#allocation7 + $0x1], 1 }
 0x246   :  { %824 = vsyncpa [#allocation10], 1 }
 0x247   :  { %826 = vsyncpa [#allocation10 + $0x1], 1 }
 0x248   :  { %827 = vsyncpa [#allocation8], 1 }
 0x249   :  { %829 = vsyncpa [#allocation8 + $0x1], 1 }

</bundles_post_ra>
